<compile_context>
chip_gen: v5e
topology: v5e:2x2
jax: 0.10.0
libtpu: 0.0.40
codegen_flags: <defaults>
</compile_context>

<pallas_src>
import functools

import jax
import jax.numpy as jnp
from jax import lax
from jax.experimental import pallas as pl
from jax.experimental.pallas import tpu as pltpu

LN_EPS = 1e-5  # PyTorch nn.LayerNorm default

_LANE = 128
_SUBLANE = 8
_TILE_BYTE_BUDGET = 44 * 1024 * 1024   # double-buffered IO streams + f32 temps
_VMEM_LIMIT_BYTES = 56 * 1024 * 1024   # scoped VMEM cap (< v7x's 64 MiB physical)
_F32_TEMPS = 4                         # rough count of live full-block f32 temps


def _round_up(n, m):
    return ((n + m - 1) // m) * m


def _pick_tile_rows(rows, d_pad, io_itemsize, n_streams):
    """Largest row tile whose pipeline buffers + f32 temps fit the VMEM budget."""
    per_row = d_pad * (io_itemsize * n_streams * 2 + 4 * _F32_TEMPS)
    t = _TILE_BYTE_BUDGET // max(per_row, 1)
    t = max(_SUBLANE, min(1024, (t // _SUBLANE) * _SUBLANE))
    rows8 = _round_up(rows, _SUBLANE)
    t = min(t, rows8)
    # Keep at least 2 grid steps when there is enough work so v7x's two
    # TensorCores both get a share (the grid axis is "parallel").
    if t >= rows8 and rows8 >= 2 * _SUBLANE:
        t = _round_up(rows8 // 2, _SUBLANE)
    return int(t)


def _layernorm_affine(h, g_ref, b_ref, o_ref, inv_d):
    """Single-pass LayerNorm stats + affine; h is f32 (TR, Dpad)."""
    row_sum = jnp.sum(h, axis=-1, keepdims=True)
    row_sumsq = jnp.sum(h * h, axis=-1, keepdims=True)
    mean = row_sum * inv_d
    var = jnp.maximum(row_sumsq * inv_d - mean * mean, 0.0)
    norm = (h - mean) * lax.rsqrt(var + LN_EPS)
    o_ref[...] = (norm * g_ref[...] + b_ref[...]).astype(o_ref.dtype)


def _residual_ln_kernel(x_ref, s_ref, g_ref, b_ref, o_ref, *, inv_d):
    """Eval mode: h = x + sublayer(x); out = LayerNorm(h)*gamma + beta."""
    h = x_ref[...].astype(jnp.float32) + s_ref[...].astype(jnp.float32)
    _layernorm_affine(h, g_ref, b_ref, o_ref, inv_d)


def _residual_ln_dropout_kernel(x_ref, s_ref, m_ref, g_ref, b_ref, o_ref, *, inv_d):
    """Training mode: h = x + mask * sublayer(x); mask is pre-scaled by 1/(1-p)."""
    s = s_ref[...].astype(jnp.float32) * m_ref[...].astype(jnp.float32)
    h = x_ref[...].astype(jnp.float32) + s
    _layernorm_affine(h, g_ref, b_ref, o_ref, inv_d)


def residual_connection(x, sublayer_out, gamma, beta, *,
                        p=0.1, training=False, rng=None, tile_rows=None):
    """out = LayerNorm(x + dropout(sublayer_out)) with affine (gamma, beta)."""
    assert x.shape == sublayer_out.shape
    B, S, D = x.shape
    rows = B * S
    out_dtype = x.dtype

    x2 = x.reshape(rows, D)
    s2 = sublayer_out.reshape(rows, D).astype(out_dtype)

    use_dropout = bool(training) and float(p) > 0.0
    inputs = [x2, s2]
    if use_dropout:
        if rng is None:
            rng = jax.random.PRNGKey(0)
        keep_p = 1.0 - float(p)
        if keep_p <= 0.0:
            # p >= 1: drop everything (avoids the 1/(1-p) overflow pitfall).
            mask2 = jnp.zeros((rows, D), dtype=out_dtype)
        else:
            keep = jax.random.bernoulli(rng, keep_p, (rows, D))
            mask2 = keep.astype(out_dtype) * jnp.asarray(1.0 / keep_p, out_dtype)
        inputs.append(mask2)

    # Lane-dense last dim: pad D to a multiple of 128.  Zero padding is exact
    # for the statistics because the kernel divides by the real D (inv_d).
    d_pad = _round_up(D, _LANE)
    g2 = gamma.astype(jnp.float32).reshape(1, D)
    b2 = beta.astype(jnp.float32).reshape(1, D)
    if d_pad != D:
        inputs = [jnp.pad(a, ((0, 0), (0, d_pad - D))) for a in inputs]
        g2 = jnp.pad(g2, ((0, 0), (0, d_pad - D)))
        b2 = jnp.pad(b2, ((0, 0), (0, d_pad - D)))

    n_streams = len(inputs) + 1  # + output
    if tile_rows is None:
        tile_rows = _pick_tile_rows(rows, d_pad,
                                    jnp.dtype(out_dtype).itemsize, n_streams)
    rows_pad = _round_up(rows, tile_rows)
    if rows_pad != rows:
        inputs = [jnp.pad(a, ((0, rows_pad - rows), (0, 0))) for a in inputs]

    row_spec = pl.BlockSpec((tile_rows, d_pad), lambda i: (i, 0))
    vec_spec = pl.BlockSpec((1, d_pad), lambda i: (0, 0))
    in_specs = [row_spec] * len(inputs) + [vec_spec, vec_spec]

    kern = _residual_ln_dropout_kernel if use_dropout else _residual_ln_kernel
    kernel = functools.partial(kern, inv_d=1.0 / D)

    out = pl.pallas_call(
        kernel,
        out_shape=jax.ShapeDtypeStruct((rows_pad, d_pad), out_dtype),
        grid_spec=pltpu.PrefetchScalarGridSpec(
            num_scalar_prefetch=0,
            grid=(rows_pad // tile_rows,),
            in_specs=in_specs,
            out_specs=row_spec,
        ),
        compiler_params=pltpu.CompilerParams(
            dimension_semantics=("parallel",),
            vmem_limit_bytes=_VMEM_LIMIT_BYTES,
        ),
    )(*inputs, g2, b2)

    return out[:rows, :D].reshape(B, S, D)


def _layernorm_ref(h, gamma, beta):
    mean = jnp.mean(h, axis=-1, keepdims=True)
    var = jnp.mean((h - mean) ** 2, axis=-1, keepdims=True)
    return (h - mean) / jnp.sqrt(var + LN_EPS) * gamma + beta


if __name__ == "__main__":
    batch, seq, d_model = 2, 8, 32

    key = jax.random.PRNGKey(0)
    kx, kw, kb, kd = jax.random.split(key, 4)
    x = jax.random.normal(kx, (batch, seq, d_model), dtype=jnp.float32)

    # Deterministic sublayer: a simple linear projection, evaluated in plain JAX
    # (the `sublayer` argument of forward() is an external callable, not a
    # parameter of the module itself).
    W = jax.random.normal(kw, (d_model, d_model), dtype=jnp.float32) * 0.1
    bvec = jax.random.normal(kb, (d_model,), dtype=jnp.float32) * 0.1
    sublayer = lambda t: t @ W + bvec
    sub_out = sublayer(x)

    # LayerNorm affine params (elementwise_affine=True); deterministic, nontrivial.
    gamma = 1.0 + 0.01 * jnp.arange(d_model, dtype=jnp.float32)
    beta = 0.02 * jnp.arange(d_model, dtype=jnp.float32)

    # Eval mode (dropout = identity, matches PyTorch .eval()), f32 I/O.
    out = residual_connection(x, sub_out, gamma, beta, p=0.1, training=False)
    out = jax.block_until_ready(out)
    ref = _layernorm_ref(x + sub_out, gamma, beta)
    assert jnp.allclose(out, ref, atol=1e-4, rtol=1e-4), "f32 mismatch vs reference"

    # Eval mode, bf16 I/O (stats computed in f32 inside the kernel).
    out_bf16 = residual_connection(x.astype(jnp.bfloat16),
                                   sub_out.astype(jnp.bfloat16),
                                   gamma, beta, p=0.1, training=False)
    out_bf16 = jax.block_until_ready(out_bf16)
    assert out_bf16.dtype == jnp.bfloat16
    assert jnp.allclose(out_bf16.astype(jnp.float32), ref, atol=1e-1, rtol=1e-1), \
        "bf16 mismatch vs reference"

    # Training mode: dropout mask generated with jax.random (grid-invariant,
    # reproducible across tile sizes) and applied inside the kernel.
    out_train = residual_connection(x, sub_out, gamma, beta,
                                    p=0.1, training=True, rng=kd)
    out_train = jax.block_until_ready(out_train)
    assert bool(jnp.all(jnp.isfinite(out_train))), "training output not finite"

    print("KERNEL_OK")
</pallas_src>

<mosaic_0001>
module attributes {stable_mosaic.version = 11 : i64} {
  func.func @_residual_ln_kernel(%arg0: i32, %arg1: memref<8x128xf32, #tpu.memory_space<vmem>>, %arg2: memref<8x128xf32, #tpu.memory_space<vmem>>, %arg3: memref<1x128xf32, #tpu.memory_space<vmem>>, %arg4: memref<1x128xf32, #tpu.memory_space<vmem>>, %arg5: memref<8x128xf32, #tpu.memory_space<vmem>>) attributes {dimension_semantics = [#tpu.dimension_semantics<parallel>], iteration_bounds = array<i64: 2>, scalar_prefetch = 0 : i64, scratch_operands = 0 : i64, tpu.core_type = #tpu.core_type<tc>, window_params = [{transform_indices = @transform_0, window_bounds = array<i64: 8, 128>}, {transform_indices = @transform_1, window_bounds = array<i64: 8, 128>}, {pipeline_mode = #tpu.pipeline_mode<synchronous>, transform_indices = @transform_2, window_bounds = array<i64: 1, 128>}, {pipeline_mode = #tpu.pipeline_mode<synchronous>, transform_indices = @transform_3, window_bounds = array<i64: 1, 128>}, {transform_indices = @transform_4, window_bounds = array<i64: 8, 128>}]} {
    %c0 = arith.constant 0 : index
    %c0_0 = arith.constant 0 : index
    %0 = vector.load %arg1[%c0, %c0_0] : memref<8x128xf32, #tpu.memory_space<vmem>>, vector<8x128xf32>
    %c0_1 = arith.constant 0 : index
    %c0_2 = arith.constant 0 : index
    %1 = vector.load %arg2[%c0_1, %c0_2] : memref<8x128xf32, #tpu.memory_space<vmem>>, vector<8x128xf32>
    %2 = arith.addf %0, %1 : vector<8x128xf32>
    %cst = arith.constant dense<0.000000e+00> : vector<8xf32>
    %3 = vector.multi_reduction <add>, %2, %cst [1] : vector<8x128xf32> to vector<8xf32>
    %4 = vector.shape_cast %3 : vector<8xf32> to vector<8x1xf32>
    %5 = arith.mulf %2, %2 : vector<8x128xf32>
    %cst_3 = arith.constant dense<0.000000e+00> : vector<8xf32>
    %6 = vector.multi_reduction <add>, %5, %cst_3 [1] : vector<8x128xf32> to vector<8xf32>
    %7 = vector.shape_cast %6 : vector<8xf32> to vector<8x1xf32>
    %cst_4 = arith.constant 3.125000e-02 : f32
    %8 = vector.broadcast %cst_4 : f32 to vector<8x1xf32>
    %9 = arith.mulf %4, %8 : vector<8x1xf32>
    %cst_5 = arith.constant 3.125000e-02 : f32
    %10 = vector.broadcast %cst_5 : f32 to vector<8x1xf32>
    %11 = arith.mulf %7, %10 : vector<8x1xf32>
    %12 = arith.mulf %9, %9 : vector<8x1xf32>
    %13 = arith.subf %11, %12 : vector<8x1xf32>
    %cst_6 = arith.constant 0.000000e+00 : f32
    %14 = vector.broadcast %cst_6 : f32 to vector<8x1xf32>
    %15 = arith.maximumf %13, %14 : vector<8x1xf32>
    %16 = vector.broadcast %9 : vector<8x1xf32> to vector<8x128xf32>
    %17 = arith.subf %2, %16 : vector<8x128xf32>
    %cst_7 = arith.constant 9.99999974E-6 : f32
    %18 = vector.broadcast %cst_7 : f32 to vector<8x1xf32>
    %19 = arith.addf %15, %18 : vector<8x1xf32>
    %20 = math.rsqrt %19 : vector<8x1xf32>
    %21 = vector.broadcast %20 : vector<8x1xf32> to vector<8x128xf32>
    %22 = arith.mulf %17, %21 : vector<8x128xf32>
    %c0_8 = arith.constant 0 : index
    %c0_9 = arith.constant 0 : index
    %23 = vector.load %arg3[%c0_8, %c0_9] : memref<1x128xf32, #tpu.memory_space<vmem>>, vector<1x128xf32>
    %24 = vector.broadcast %23 : vector<1x128xf32> to vector<8x128xf32>
    %25 = arith.mulf %22, %24 : vector<8x128xf32>
    %c0_10 = arith.constant 0 : index
    %c0_11 = arith.constant 0 : index
    %26 = vector.load %arg4[%c0_10, %c0_11] : memref<1x128xf32, #tpu.memory_space<vmem>>, vector<1x128xf32>
    %27 = vector.broadcast %26 : vector<1x128xf32> to vector<8x128xf32>
    %28 = arith.addf %25, %27 : vector<8x128xf32>
    %c0_12 = arith.constant 0 : index
    %c0_13 = arith.constant 0 : index
    %29 = vector.load %arg5[%c0_12, %c0_13] : memref<8x128xf32, #tpu.memory_space<vmem>>, vector<8x128xf32>
    tpu.vector_store %arg5[%c0_12, %c0_13], %28 {strides = array<i32>} : memref<8x128xf32, #tpu.memory_space<vmem>>, vector<8x128xf32>,
    return
  }
  func.func @transform_0(%arg0: i32) -> (i32, i32) {
    %c0_i32 = arith.constant 0 : i32
    %c0_i32_0 = arith.constant 0 : i32
    return %arg0, %c0_i32 : i32, i32
  }
  func.func @transform_1(%arg0: i32) -> (i32, i32) {
    %c0_i32 = arith.constant 0 : i32
    %c0_i32_0 = arith.constant 0 : i32
    return %arg0, %c0_i32 : i32, i32
  }
  func.func @transform_2(%arg0: i32) -> (i32, i32) {
    %c0_i32 = arith.constant 0 : i32
    %c0_i32_0 = arith.constant 0 : i32
    %c0_i32_1 = arith.constant 0 : i32
    return %c0_i32, %c0_i32_0 : i32, i32
  }
  func.func @transform_3(%arg0: i32) -> (i32, i32) {
    %c0_i32 = arith.constant 0 : i32
    %c0_i32_0 = arith.constant 0 : i32
    %c0_i32_1 = arith.constant 0 : i32
    return %c0_i32, %c0_i32_0 : i32, i32
  }
  func.func @transform_4(%arg0: i32) -> (i32, i32) {
    %c0_i32 = arith.constant 0 : i32
    %c0_i32_0 = arith.constant 0 : i32
    return %arg0, %c0_i32 : i32, i32
  }
}

</mosaic_0001>

<bundles_post_ra>
// kernel: tpu_custom_call.1
= control target key start
LH: loop header
LB: loop body
LE: loop exit
PB: predicated region body
PF: predicated region fallthrough
CT: control target
= control target key end

     0   :  { %s798_s0 = inlined_call_operand.hbm [shape: f32[16,128], index: 0, kind: input, shape index: {}]   ;;  %s799_s1 = inlined_call_operand.hbm [shape: f32[16,128], index: 1, kind: input, shape index: {}]   ;;  %s800_s2 = inlined_call_operand.vmem [shape: f32[1,128], index: 2, kind: input, shape index: {}]   ;;  %s801_s3 = inlined_call_operand.vmem [shape: f32[1,128], index: 3, kind: input, shape index: {}]   ;;  %s802_s4 = inlined_call_operand.hbm [shape: f32[16,128], index: 4, kind: output, shape index: {}]  }
   0x1   :  { %803 = sst [smem:[#allocation11_spill]] %s798_s0 }
   0x2   :  { %9 = vsyncpa [#allocation3], 0 }
   0x3   :  { %11 = vsyncpa [#allocation3 + $0x1], 0 }
   0x4   :  { %12 = vsyncpa [#allocation6], 0 }
   0x5   :  { %14 = vsyncpa [#allocation6 + $0x1], 0 }
   0x6   :  { %15 = vsyncpa [#allocation4], 0 }
   0x7   :  { %17 = vsyncpa [#allocation4 + $0x1], 0  ;;  %s627_s15 = smov 0   ;;  %s629_s16 = smov 0  }
   0x8   :  { %s631_s17 = smov 0   ;;  %s633_s18 = smov 0  }
   0x9 LB: > { %s648_s19 = sadd.s32 4294967295, %s600_s18   ;;  %s400_s20 = sadd.s32 4294967294, %s600_s18   ;;  %s600_s18 = sphi %s633_s18, %s815_s18   ;;  %s596_s17 = sphi %s631_s17, %s814_s17   ;;  %s592_s16 = sphi %s629_s16, %s813_s16   ;;  %s588_s15 = sphi %s627_s15, %s812_s15  }
   0xa   : > { %s652_s21 = sadd.s32 1, %s600_s18   ;;  %s30_s22 = sadd.s32 1, %s596_s17 }
   0xb   : > { %s27_s23 = ssub.s32 %s600_s18, %s652_s21  ;;  %p37_p0 = scmp.ne.s32.totalorder %s596_s17, %s592_s16 }
   0xc   : > { %p28_p1 = scmp.eq.s32.totalorder %s27_s23, 0  ;;  %p38_p2 = scmp.eq.s32.totalorder %s600_s18, 0 }
   0xd   : > { %p43_p3 = scmp.ne.s32.totalorder %s592_s16, %s588_s15  ;;  %p44_p4 = scmp.eq.s32.totalorder %s648_s19, 0 }
   0xe   : > { %s664_s24 = scalar_select %p28_p1, %s596_s17, %s30_s22  }
   0xf   : > { %p666_p5 = por %p38_p2, %p37_p0  ;;  %p670_p6 = por %p44_p4, %p43_p3 }
  0x10   : > { %p135_p7 = scmp.eq.s32.totalorder %s648_s19, 1  ;;  %p141_p8 = scmp.eq.s32.totalorder %s400_s20, 1 }
  0x11   : > { %p432_p10 = scmp.lt.s32.totalorder %s600_s18, 2  ;;  %s686_s29 = sand.u32 1, %s596_s17  }
  0x12   : > { %p677_p11 = por %p135_p7, %p37_p0  ;;  %p681_p12 = por %p141_p8, %p43_p3 }
  0x13   : > { %s404_s30 = sshll.u32 %s600_s18, 3  ;;  %s403_s5 = sshll.u32 %s686_s29, 3 }
  0x14   : > { %s808_s0 = sld [smem:[#allocation11_spill]]  ;;  %s171_s10 = scalar_lea.vmem [#allocation2], %s403_s5 }
  0x15   : > { %s179_s11 = sshll.u32 %s171_s10, 4  ;;  %p695_p13 = pnand %p432_p10, %p666_p5  ;;  %s180_s11 = int_to_ptr.vmem [resolvable:$true] %s179_s11 }
  0x16   : > { %p407_p0 = scmp.ge.s32.totalorder %s600_s18, 1  ;;  %p203_p1 = scmp.lt.s32.totalorder %s600_s18, 3 }
  0x17   : > { %s168_s13 = scalar_lea.sflag [#allocation3], %s686_s29  ;;  %p474_p3 = pneg %p695_p13 }
  0x1a   : > { %s175_s8 = scalar_lea.hbm %s808_s0, %s404_s30  ;;  %s477_s25 = scalar_lea.hbm %s808_s0, 16 }
  0x1b   : > { %s177_s9 = sshll.u32 %s175_s8, 4  ;;  %s178_s9 = int_to_ptr.hbm [resolvable:$true] %s177_s9 }
  0x1c   : > { %s470_s14 = sshra.s32 %s178_s9, 4  ;;  %s471_s14 = int_to_ptr.hbm [resolvable:$true] %s470_s14 }
  0x1d   : > { %s472_s20 = scalar_lea.hbm %s471_s14, 8  ;;  %p478_p5 = scmp.lt.s32.totalorder %s471_s14, %s808_s0 }
  0x1e   : > { %p473_p2 = scmp.ne.s32.totalorder %s471_s14, %s472_s20  ;;  %p479_p8 = scmp.lt.s32.totalorder %s477_s25, %s472_s20 }
  0x20   : > { %p475_p4 = pnand %p474_p3, %p473_p2  ;;  %p480_p10 = por %p479_p8, %p478_p5 }
  0x22   : > { %p476_p7 = pneg %p475_p4 }
  0x24   : > { %p481_p9 = pnand %p480_p10, %p476_p7 }
  0x26   : > { %484 = shalt.err (!%p481_p9)
}
  0x27   : > { %424 = dma.hbm_to_vmem [thread:$0]  (!%p695_p13), %s178_s9, 128, %s180_s11, %s168_s13  }
  0x28   : > { %p719_p2 = pnand %p407_p0, %p203_p1  ;;  %s194_s14 = scalar_lea.hbm %s799_s1, %s404_s30 }
  0x29   : > { %s196_s20 = sshll.u32 %s194_s14, 4  ;;  %s190_s23 = scalar_lea.vmem [#allocation5], %s403_s5  ;;  %s197_s20 = int_to_ptr.hbm [resolvable:$true] %s196_s20 }
  0x2a   : > { %s198_s25 = sshll.u32 %s190_s23, 4  ;;  %s187_s6 = scalar_lea.sflag [#allocation6], %s686_s29  ;;  %s199_s25 = int_to_ptr.vmem [resolvable:$true] %s198_s25 }
  0x2b   : > { %s500_s7 = sshra.s32 %s197_s20, 4  ;;  %s507_s13 = scalar_lea.hbm %s799_s1, 16  ;;  %s501_s7 = int_to_ptr.hbm [resolvable:$true] %s500_s7 }
  0x2c   : > { %s502_s0 = scalar_lea.hbm %s501_s7, 8  ;;  %p508_p4 = scmp.lt.s32.totalorder %s501_s7, %s799_s1 }
  0x2d   : > { %p503_p9 = scmp.ne.s32.totalorder %s501_s7, %s502_s0  ;;  %p509_p7 = scmp.lt.s32.totalorder %s507_s13, %s502_s0 }
  0x2f   : > { %p505_p0 = pnand %p503_p9, %p474_p3  ;;  %p510_p5 = por %p509_p7, %p508_p4 }
  0x31   : > { %p506_p1 = pneg %p505_p0 }
  0x33   : > { %p511_p8 = pnand %p510_p5, %p506_p1 }
  0x35   : > { %514 = shalt.err (!%p511_p8)
}
  0x36   : > { %427 = dma.hbm_to_vmem [thread:$0]  (!%p695_p13), %s197_s20, 128, %s199_s25, %s187_s6  }
  0x37   : > { %207 = sbr.rel (%p719_p2) target bundleno = 225 (0xe1), region = 36  ;;  %s741_s29 = sand.u32 (!%p719_p2), 1, %s592_s16  }
  0x38   : > { %s744_s5 = sshll.u32 (!%p719_p2), %s741_s29, 3  ;;  %s210_s22 = scalar_lea.sflag (!%p719_p2), [#allocation3], %s741_s29 }
  0x39   : > { %s213_s0 = scalar_lea.vmem (!%p719_p2), [#allocation2], %s744_s5 }
  0x3c   : > { %575 = dma.done.wait (%p670_p6), %s210_s22, 128  }
  0x3d   : > { %577 = vsyncadd (%p670_p6), %s210_s22, 4294967168  ;;  %s220_s12 = scalar_lea.sflag [#allocation6], %s741_s29  ;;  %s223_s8 = scalar_lea.vmem [#allocation5], %s744_s5 }
  0x3e   : > { %579 = dma.done.wait (%p670_p6), %s220_s12, 128  }
  0x3f   : > { %581 = vsyncadd (%p670_p6), %s220_s12, 4294967168  ;;  %v254_v0 = vld [vmem:[%s213_s0] sm:$0xff]  ;;  %v255_v1 = vld [vmem:[%s223_s8] sm:$0xff]  ;;  %s412_s26 = sshll.u32 %s648_s19, 3  ;;  %s253_s19 = scalar_lea.vmem [#allocation7], %s744_s5 }
  0x40   : > { %v256_v2 = vadd.f32 %v255_v1, %v254_v0  ;;  %v466_v19 = vld [vmem:[%s800_s2] ss:$0 sm:$0xff]  ;;  %s302_s6 = scalar_lea.hbm %s802_s4, %s412_s26  ;;  %s304_s11 = sshll.u32 %s253_s19, 4  ;;  %s305_s11 = int_to_ptr.vmem [resolvable:$true] %s304_s11 }
  0x41   : > { %v467_v22 = vld [vmem:[%s801_s3] ss:$0 sm:$0xff]  ;;  %s306_s13 = sshll.u32 %s302_s6, 4  ;;  %s292_s10 = scalar_lea.sflag [#allocation4], %s741_s29  ;;  %s307_s13 = int_to_ptr.hbm [resolvable:$true] %s306_s13 }
  0x42   : > { %257 = vadd.xlane.f32.xlu0 %v256_v2  ;;  %v259_v3 = vmul.f32 %v256_v2, %v256_v2  ;;  %s544_s30 = sshra.s32 %s307_s13, 4  ;;  %s550_s8 = scalar_lea.hbm %s802_s4, 16  ;;  %s545_s30 = int_to_ptr.hbm [resolvable:$true] %s544_s30 }
  0x43   : > { %s546_s22 = scalar_lea.hbm %s545_s30, 8  ;;  %p551_p10 = scmp.lt.s32.totalorder %s545_s30, %s802_s4 }
  0x44   : > { %p547_p6 = scmp.ne.s32.totalorder %s545_s30, %s546_s22  ;;  %p552_p2 = scmp.lt.s32.totalorder %s550_s8, %s546_s22 }
  0x46   : > { %p548_p13 = pnand %p547_p6, %p677_p11  ;;  %p553_p9 = por %p552_p2, %p551_p10 }
  0x48   : > { %p549_p3 = pneg %p548_p13 }
  0x4a   : > { %260 = vadd.xlane.f32.xlu0 %v259_v3  ;;  %p554_p0 = pnand %p553_p9, %p549_p3 }
  0xb5   : > { %v258_v4 = vpop.xlane.xlu0 %257 }
  0xb6   : > { %v262_v5 = vmul.f32 0.03125, %v258_v4 }
  0xb8   : > { %v264_v7 = vmul.f32 %v262_v5, %v262_v5  ;;  %v267_v18 = vsub.f32 %v256_v2, %v262_v5 }
  0xbd   : > { %v261_v6 = vpop.xlane.xlu0 %260 }
  0xbe   : > { %v263_v8 = vmul.f32 0.03125, %v261_v6 }
  0xc0   : > { %v265_v9 = vsub.f32 %v263_v8, %v264_v7 }
  0xc2   : > { %v266_v10 = vmax.f32 %v265_v9, 0.0 }
  0xc4   : > { %v268_v11 = vadd.f32 1e-05, %v266_v10 }
  0xc6   : > { %468 = vrsqrt.f32 %v268_v11  ;;  %vm275_vm1 = vweird.f32 %v268_v11 }
  0xcc   : > { %v469_v12 = vpop.eup %468 }
  0xcd   : > { %v270_v13 = vmul.f32 %v469_v12, %v268_v11  ;;  %vm276_vm0 = vweird.f32 %v469_v12 }
  0xce   : > { %vm277_vm2 = vmor %vm275_vm1, %vm276_vm0 }
  0xcf   : > { %v271_v14 = vmul.f32 %v469_v12, %v270_v13 }
  0xd1   : > { %v272_v15 = vmul.f32 0.5, %v271_v14 }
  0xd3   : > { %v273_v16 = vsub.f32 1.5, %v272_v15 }
  0xd5   : > { %v274_v17 = vmul.f32 %v469_v12, %v273_v16 }
  0xd7   : > { %v278_v20 = vsel %vm277_vm2, %v469_v12, %v274_v17 }
  0xd8   : > { %v279_v21 = vmul.f32 %v278_v20, %v267_v18 }
  0xda   : > { %v284_v23 = vmul.f32 %v466_v19, %v279_v21 }
  0xdc   : > { %v289_v24 = vadd.f32 %v467_v22, %v284_v23 }
  0xde   : > { %290 = vst [vmem:[%s253_s19] sm:$0xff] %v289_v24 }
  0xdf   : > { %557 = shalt.err (!%p554_p0)
}
  0xe0   : > { %419 = dma.vmem_to_hbm [thread:$0]  (%p677_p11), %s305_s11, 128, %s307_s13, %s292_s10  }
  0xe1 PF: > { %s318_s29 = sand.u32 1, %s588_s15   ;;  %p811_p1 = scmp.ge.s32.totalorder %s600_s18, 2 }
  0xe2   : > { %s319_s14 = scalar_lea.sflag [#allocation4], %s318_s29 }
  0xe3   : > { %p429_p4 = pnand %p811_p1, %p681_p12 }
  0xe5   : > { %p430_p7 = pneg %p429_p4 }
  0xe7   : > { %583 = dma.done.wait (%p430_p7), %s319_s14, 128  }
  0xe8   : > { %585 = vsyncadd (%p430_p7), %s319_s14, 4294967168  ;;  %p20_p5 = scmp.ge.s32.totalorder %s652_s21, 4   ;;  %s812_s15 = smov %s592_s16 }
  0xe9   : > { %s813_s16 = smov %s596_s17  ;;  %s814_s17 = smov %s664_s24 }
  0xea   : > { %s815_s18 = smov %s652_s21  ;;  %22 = sbr.rel (!%p20_p5) target bundleno = 9 (0x9), region = 94 }
  0xef   :  { %325 = vsyncpa [#allocation3], 1 }
  0xf0   :  { %327 = vsyncpa [#allocation3 + $0x1], 1 }
  0xf1   :  { %328 = vsyncpa [#allocation6], 1 }
  0xf2   :  { %330 = vsyncpa [#allocation6 + $0x1], 1 }
  0xf3   :  { %331 = vsyncpa [#allocation4], 1 }
  0xf4   :  { %333 = vsyncpa [#allocation4 + $0x1], 1 }

</bundles_post_ra>
